<compile_context>
chip_gen: v7x
topology: tpu7x:2x2x1
jax: 0.10.0
libtpu: 0.0.40
codegen_flags: <defaults>
</compile_context>

<pallas_src>
import functools

import jax
import jax.numpy as jnp
from jax.experimental import pallas as pl
from jax.experimental.pallas import tpu as pltpu

HIDDEN = 100          # logical hidden size (matches nn.Linear(1, 100))
HIDDEN_PAD = 128      # padded to one full lane width
TILE_B_MAX = 1024     # batch tile cap (v7x VMEM-safe)


def _lambda_kernel(t_ref, wb1_ref, w2_ref, small_ref, out_ref):
    t = t_ref[...]                                   # (TB, 1)

    wb1 = wb1_ref[...]                               # (2, 128)
    w1 = wb1[0:1, :]                                 # (1, 128)
    b1 = wb1[1:2, :]                                 # (1, 128)

    # fc1 + ReLU as a VPU broadcast (rank-1 outer product, no MXU round-trip).
    h = jnp.maximum(t * w1 + b1, 0.0)                # (TB, 128)

    # fc2 on the MXU (K = 128, one clean contraction tile).
    x = jnp.dot(h, w2_ref[...], preferred_element_type=jnp.float32)   # (TB, 2)

    small = small_ref[...]                           # (8, 2) packed constants
    b2 = small[0:1, :]
    init_p = small[1:2, :]
    final_p = small[2:3, :]
    min_b = small[3:4, :]
    max_b = small[4:5, :]

    x = x + b2
    # protocol blend: final*t + init*(1-t) + x*(t-0)*(t-1)
    blend = final_p * t + init_p * (1.0 - t) + x * t * (t - 1.0)
    # clamp(|blend|, min=minimum_bound, max=maximum_bound)
    # (for isothermal col 0: min == max == T, so the column is forced to exactly T)
    out_ref[...] = jnp.clip(jnp.abs(blend), min_b, max_b)


def _round_up(x, m):
    return -(-x // m) * m


def _lambda_i_pallas(params, t_frac):
    t = t_frac.astype(jnp.float32).reshape(-1, 1)
    B = t.shape[0]

    # Pad batch to a multiple of 8 (sublane) and pick a tile size.
    Bp = max(8, _round_up(B, 8))
    if Bp > TILE_B_MAX:
        tile_b = TILE_B_MAX
        Bp = _round_up(Bp, tile_b)
    else:
        tile_b = Bp
    if Bp != B:
        t = jnp.pad(t, ((0, Bp - B), (0, 0)))

    grid = (Bp // tile_b,)

    out = pl.pallas_call(
        _lambda_kernel,
        out_shape=jax.ShapeDtypeStruct((Bp, 2), jnp.float32),
        grid_spec=pltpu.PrefetchScalarGridSpec(
            num_scalar_prefetch=0,
            grid=grid,
            in_specs=[
                pl.BlockSpec((tile_b, 1), lambda i: (i, 0)),          # t tile
                pl.BlockSpec((2, HIDDEN_PAD), lambda i: (0, 0)),      # [w1; b1] resident
                pl.BlockSpec((HIDDEN_PAD, 2), lambda i: (0, 0)),      # w2 resident
                pl.BlockSpec((8, 2), lambda i: (0, 0)),               # packed small params
            ],
            out_specs=pl.BlockSpec((tile_b, 2), lambda i: (i, 0)),
        ),
        compiler_params=pltpu.CompilerParams(
            dimension_semantics=("parallel",),
            vmem_limit_bytes=4 * 1024 * 1024,
        ),
        cost_estimate=pl.CostEstimate(
            flops=2 * Bp * HIDDEN_PAD * 3 + 16 * Bp,
            transcendentals=0,
            bytes_accessed=(Bp * 1 + Bp * 2 + 2 * HIDDEN_PAD + HIDDEN_PAD * 2 + 16) * 4,
        ),
    )(t, params["wb1"], params["w2p"], params["small"])

    return out[:B]


def _init_lambda_i(key, is_isothermal_step, init_protocol, final_protocol):
    """Deterministic parameter init mimicking nn.Linear defaults + operand packing."""
    init_protocol = jnp.asarray(init_protocol, jnp.float32)
    final_protocol = jnp.asarray(final_protocol, jnp.float32)

    k1, k2, k3, k4 = jax.random.split(key, 4)
    bound1 = 1.0                               # fc1: in_features = 1
    bound2 = 1.0 / float(jnp.sqrt(float(HIDDEN)))  # fc2: in_features = 100
    w1 = jax.random.uniform(k1, (1, HIDDEN), jnp.float32, -bound1, bound1)
    b1 = jax.random.uniform(k2, (1, HIDDEN), jnp.float32, -bound1, bound1)

    if is_isothermal_step:
        assert float(init_protocol[0]) == float(final_protocol[0])
        T = float(init_protocol[0])
        init_p = init_protocol[1:]             # (1,)
        final_p = final_protocol[1:]           # (1,)
        D = 1
    else:
        init_p = init_protocol                 # (2,)
        final_p = final_protocol               # (2,)
        D = 2

    w2 = jax.random.uniform(k3, (HIDDEN, D), jnp.float32, -bound2, bound2)
    b2 = jax.random.uniform(k4, (D,), jnp.float32, -bound2, bound2)

    min_b = jnp.minimum(init_p, final_p)
    max_b = jnp.maximum(init_p, final_p)

    # Zero-pad hidden 100 -> 128. Padded w2 rows are zero => padded lanes
    # contribute nothing to fc2, result identical to the unpadded network.
    w1p = jnp.zeros((1, HIDDEN_PAD), jnp.float32).at[:, :HIDDEN].set(w1)
    b1p = jnp.zeros((1, HIDDEN_PAD), jnp.float32).at[:, :HIDDEN].set(b1)
    wb1 = jnp.concatenate([w1p, b1p], axis=0)            # (2, 128)

    if is_isothermal_step:
        # Column 0 carries T: zero its MLP weights/bias and set min==max==T so
        # clamp forces it to exactly T. Column 1 is the real 1-dim protocol.
        w2p = jnp.zeros((HIDDEN_PAD, 2), jnp.float32).at[:HIDDEN, 1:2].set(w2)
        b2_2 = jnp.array([0.0, float(b2[0])], jnp.float32)
        init_2 = jnp.array([T, float(init_p[0])], jnp.float32)
        final_2 = jnp.array([T, float(final_p[0])], jnp.float32)
        min_2 = jnp.array([T, float(min_b[0])], jnp.float32)
        max_2 = jnp.array([T, float(max_b[0])], jnp.float32)
    else:
        w2p = jnp.zeros((HIDDEN_PAD, 2), jnp.float32).at[:HIDDEN, :].set(w2)
        b2_2, init_2, final_2, min_2, max_2 = b2, init_p, final_p, min_b, max_b

    small = jnp.zeros((8, 2), jnp.float32)
    small = small.at[0].set(b2_2).at[1].set(init_2).at[2].set(final_2)
    small = small.at[3].set(min_2).at[4].set(max_2)

    return dict(wb1=wb1, w2p=w2p, small=small)


def _lambda_i_ref(params, t_frac):
    """Plain-JAX reference of the same (packed) math, for a sanity check."""
    t = t_frac.astype(jnp.float32).reshape(-1, 1)
    w1 = params["wb1"][0:1, :]
    b1 = params["wb1"][1:2, :]
    h = jnp.maximum(t * w1 + b1, 0.0)
    x = h @ params["w2p"] + params["small"][0:1, :]
    blend = (params["small"][2:3, :] * t
             + params["small"][1:2, :] * (1.0 - t)
             + x * t * (t - 1.0))
    return jnp.clip(jnp.abs(blend), params["small"][3:4, :], params["small"][4:5, :])


class LambdaPallas:
    """JAX/Pallas equivalent of the PyTorch `Lambda` module (forward only)."""

    def __init__(self, protocol, is_isothermal, *, seed=0):
        num_steps = len(protocol)
        keys = jax.random.split(jax.random.PRNGKey(seed), num_steps)
        self.lambdas = [
            _init_lambda_i(
                keys[i],
                is_isothermal_step=is_isothermal[i],
                init_protocol=protocol[i],
                final_protocol=protocol[(i + 1) % num_steps],
            )
            for i in range(num_steps)
        ]

    def __call__(self, i, t_frac):
        # `i` is a Python int selecting the sub-module (same as nn.ModuleList indexing).
        return _lambda_i_pallas(self.lambdas[i], t_frac)


if __name__ == "__main__":
    key = jax.random.PRNGKey(0)

    # Two-step protocol: step 0 is isothermal (same T on both ends), step 1 is not.
    protocol = [[0.1, 1.0], [0.1, 2.0]]
    is_isothermal = [True, False]

    model = LambdaPallas(protocol, is_isothermal, seed=0)

    B = 8
    t_frac = jax.random.uniform(key, (B, 1), jnp.float32)   # t in [0, 1)

    out0 = model(0, t_frac)   # isothermal step     -> (B, 2) = [T, k]
    out1 = model(1, t_frac)   # non-isothermal step -> (B, 2) = [T, k]
    jax.block_until_ready(out0)
    jax.block_until_ready(out1)

    assert out0.shape == (B, 2) and out1.shape == (B, 2)
    assert out0.dtype == jnp.float32 and out1.dtype == jnp.float32

    # Sanity check against a plain-JAX reference of the same math.
    ref0 = _lambda_i_ref(model.lambdas[0], t_frac)
    ref1 = _lambda_i_ref(model.lambdas[1], t_frac)
    assert jnp.allclose(out0, ref0, rtol=2e-3, atol=2e-3)
    assert jnp.allclose(out1, ref1, rtol=2e-3, atol=2e-3)
    # Isothermal column 0 must be exactly T.
    assert jnp.all(out0[:, 0] == jnp.float32(protocol[0][0]))

    print("KERNEL_OK")
</pallas_src>

<mosaic_0001>
module attributes {stable_mosaic.version = 11 : i64} {
  func.func @_lambda_kernel(%arg0: i32, %arg1: memref<8x1xf32, #tpu.memory_space<vmem>>, %arg2: memref<2x128xf32, #tpu.memory_space<vmem>>, %arg3: memref<128x2xf32, #tpu.memory_space<vmem>>, %arg4: memref<8x2xf32, #tpu.memory_space<vmem>>, %arg5: memref<8x2xf32, #tpu.memory_space<vmem>>) attributes {dimension_semantics = [#tpu.dimension_semantics<parallel>], iteration_bounds = array<i64: 1>, scalar_prefetch = 0 : i64, scratch_operands = 0 : i64, tpu.core_type = #tpu.core_type<tc>, window_params = [{transform_indices = @transform_0, window_bounds = array<i64: 8, 1>}, {pipeline_mode = #tpu.pipeline_mode<synchronous>, transform_indices = @transform_1, window_bounds = array<i64: 2, 128>}, {pipeline_mode = #tpu.pipeline_mode<synchronous>, transform_indices = @transform_2, window_bounds = array<i64: 128, 2>}, {pipeline_mode = #tpu.pipeline_mode<synchronous>, transform_indices = @transform_3, window_bounds = array<i64: 8, 2>}, {transform_indices = @transform_4, window_bounds = array<i64: 8, 2>}]} {
    %c0 = arith.constant 0 : index
    %c0_0 = arith.constant 0 : index
    %0 = vector.load %arg1[%c0, %c0_0] : memref<8x1xf32, #tpu.memory_space<vmem>>, vector<8x1xf32>
    %c0_1 = arith.constant 0 : index
    %c0_2 = arith.constant 0 : index
    %1 = vector.load %arg2[%c0_1, %c0_2] : memref<2x128xf32, #tpu.memory_space<vmem>>, vector<2x128xf32>
    %2 = vector.extract_strided_slice %1 {offsets = [0, 0], sizes = [1, 128], strides = [1, 1]} : vector<2x128xf32> to vector<1x128xf32>
    %3 = vector.extract_strided_slice %1 {offsets = [1, 0], sizes = [1, 128], strides = [1, 1]} : vector<2x128xf32> to vector<1x128xf32>
    %4 = vector.broadcast %0 : vector<8x1xf32> to vector<8x128xf32>
    %5 = vector.broadcast %2 : vector<1x128xf32> to vector<8x128xf32>
    %6 = arith.mulf %4, %5 : vector<8x128xf32>
    %7 = vector.broadcast %3 : vector<1x128xf32> to vector<8x128xf32>
    %8 = arith.addf %6, %7 : vector<8x128xf32>
    %cst = arith.constant 0.000000e+00 : f32
    %9 = vector.broadcast %cst : f32 to vector<8x128xf32>
    %10 = arith.maximumf %8, %9 : vector<8x128xf32>
    %c0_3 = arith.constant 0 : index
    %c0_4 = arith.constant 0 : index
    %11 = vector.load %arg3[%c0_3, %c0_4] : memref<128x2xf32, #tpu.memory_space<vmem>>, vector<128x2xf32>
    %cst_5 = arith.constant dense<0.000000e+00> : vector<8x2xf32>
    %12 = tpu.matmul %10, %11, %cst_5 {dimension_numbers = #tpu.dot_dimension_numbers<[1], [0], [0], [1], [0, 0, 1, 1], [], []>} : vector<8x128xf32>, vector<128x2xf32>, vector<8x2xf32> -> vector<8x2xf32>
    %c0_6 = arith.constant 0 : index
    %c0_7 = arith.constant 0 : index
    %13 = vector.load %arg4[%c0_6, %c0_7] : memref<8x2xf32, #tpu.memory_space<vmem>>, vector<8x2xf32>
    %14 = vector.extract_strided_slice %13 {offsets = [0, 0], sizes = [1, 2], strides = [1, 1]} : vector<8x2xf32> to vector<1x2xf32>
    %15 = vector.extract_strided_slice %13 {offsets = [1, 0], sizes = [1, 2], strides = [1, 1]} : vector<8x2xf32> to vector<1x2xf32>
    %16 = vector.extract_strided_slice %13 {offsets = [2, 0], sizes = [1, 2], strides = [1, 1]} : vector<8x2xf32> to vector<1x2xf32>
    %17 = vector.extract_strided_slice %13 {offsets = [3, 0], sizes = [1, 2], strides = [1, 1]} : vector<8x2xf32> to vector<1x2xf32>
    %18 = vector.extract_strided_slice %13 {offsets = [4, 0], sizes = [1, 2], strides = [1, 1]} : vector<8x2xf32> to vector<1x2xf32>
    %19 = vector.broadcast %14 : vector<1x2xf32> to vector<8x2xf32>
    %20 = arith.addf %12, %19 : vector<8x2xf32>
    %21 = vector.broadcast %16 : vector<1x2xf32> to vector<8x2xf32>
    %22 = vector.broadcast %0 : vector<8x1xf32> to vector<8x2xf32>
    %23 = arith.mulf %21, %22 : vector<8x2xf32>
    %cst_8 = arith.constant 1.000000e+00 : f32
    %24 = vector.broadcast %cst_8 : f32 to vector<8x1xf32>
    %25 = arith.subf %24, %0 : vector<8x1xf32>
    %26 = vector.broadcast %15 : vector<1x2xf32> to vector<8x2xf32>
    %27 = vector.broadcast %25 : vector<8x1xf32> to vector<8x2xf32>
    %28 = arith.mulf %26, %27 : vector<8x2xf32>
    %29 = arith.addf %23, %28 : vector<8x2xf32>
    %30 = vector.broadcast %0 : vector<8x1xf32> to vector<8x2xf32>
    %31 = arith.mulf %20, %30 : vector<8x2xf32>
    %cst_9 = arith.constant 1.000000e+00 : f32
    %32 = vector.broadcast %cst_9 : f32 to vector<8x1xf32>
    %33 = arith.subf %0, %32 : vector<8x1xf32>
    %34 = vector.broadcast %33 : vector<8x1xf32> to vector<8x2xf32>
    %35 = arith.mulf %31, %34 : vector<8x2xf32>
    %36 = arith.addf %29, %35 : vector<8x2xf32>
    %37 = math.absf %36 : vector<8x2xf32>
    %38 = vector.broadcast %17 : vector<1x2xf32> to vector<8x2xf32>
    %39 = arith.maximumf %38, %37 : vector<8x2xf32>
    %40 = vector.broadcast %18 : vector<1x2xf32> to vector<8x2xf32>
    %41 = arith.minimumf %40, %39 : vector<8x2xf32>
    %c0_10 = arith.constant 0 : index
    %c0_11 = arith.constant 0 : index
    %42 = vector.load %arg5[%c0_10, %c0_11] : memref<8x2xf32, #tpu.memory_space<vmem>>, vector<8x2xf32>
    tpu.vector_store %arg5[%c0_10, %c0_11], %41 {strides = array<i32>} : memref<8x2xf32, #tpu.memory_space<vmem>>, vector<8x2xf32>,
    return
  }
  func.func @transform_0(%arg0: i32) -> (i32, i32) {
    %c0_i32 = arith.constant 0 : i32
    %c0_i32_0 = arith.constant 0 : i32
    return %arg0, %c0_i32 : i32, i32
  }
  func.func @transform_1(%arg0: i32) -> (i32, i32) {
    %c0_i32 = arith.constant 0 : i32
    %c0_i32_0 = arith.constant 0 : i32
    %c0_i32_1 = arith.constant 0 : i32
    return %c0_i32, %c0_i32_0 : i32, i32
  }
  func.func @transform_2(%arg0: i32) -> (i32, i32) {
    %c0_i32 = arith.constant 0 : i32
    %c0_i32_0 = arith.constant 0 : i32
    %c0_i32_1 = arith.constant 0 : i32
    return %c0_i32, %c0_i32_0 : i32, i32
  }
  func.func @transform_3(%arg0: i32) -> (i32, i32) {
    %c0_i32 = arith.constant 0 : i32
    %c0_i32_0 = arith.constant 0 : i32
    %c0_i32_1 = arith.constant 0 : i32
    return %c0_i32, %c0_i32_0 : i32, i32
  }
  func.func @transform_4(%arg0: i32) -> (i32, i32) {
    %c0_i32 = arith.constant 0 : i32
    %c0_i32_0 = arith.constant 0 : i32
    return %arg0, %c0_i32 : i32, i32
  }
}

</mosaic_0001>

<bundles_post_ra>
// kernel: tpu_custom_call.1
= control target key start
LH: loop header
LB: loop body
LE: loop exit
PB: predicated region body
PF: predicated region fallthrough
CT: control target
= control target key end

     0   :  { %v252_v0 = vmov 0   ;;  %v253_v2 = vmov 0.0|0.0   ;;  %vm254_vm0 = vmmov 0   ;;  %v255_v12 = vmov 0.0   ;;  %s341_s0 = inlined_call_operand.vmem [shape: f32[8,1], index: 0, kind: input, shape index: {}]   ;;  %s342_s2 = inlined_call_operand.vmem [shape: f32[128,2], index: 2, kind: input, shape index: {}]   ;;  %s343_s1 = inlined_call_operand.vmem [shape: f32[2,128], index: 1, kind: input, shape index: {}]   ;;  %s344_s3 = inlined_call_operand.vmem [shape: f32[8,2], index: 3, kind: input, shape index: {}]   ;;  %s345_s4 = inlined_call_operand.vmem [shape: f32[8,2], index: 4, kind: output, shape index: {}]  }
   0x1   :  { %250 = vset.pattern.permute.xlu0 %v252_v0  ;;  %v17_v1 = vld [vmem:[%s341_s0] sm:$0xff]  ;;  %222 = vmatprep.subr.bf16.mxu0 %v253_v2  ;;  %v36_v4 = vld [vmem:[%s342_s2 + $0x8] sm:$0xff]  ;;  %v37_v7 = vld [vmem:[%s342_s2 + $0x10] sm:$0xff]  ;;  %v24_v30 = vlaneseq  ;;  %vm163_vm1 = vcmask 15360  }
   0x2   :  { %v35_v3 = vld [vmem:[%s342_s2] sm:$0xff]  ;;  %21 = vperm.xlu0 %250, %v17_v1   ;;  %v131_v5 = vsub.f32 1.0, %v17_v1  ;;  %v38_v8 = vld [vmem:[%s342_s2 + $0x18] sm:$0xff]  ;;  %251 = vset.pattern.permute.xlu1 %v252_v0  ;;  %v40_v11 = vld [vmem:[%s342_s2 + $0x28] sm:$0xff]  ;;  %v169_v14 = vadd.f32 -1.0, %v17_v1 }
   0x3   :  { %v223_v6 = vpack.c.bf16 %v36_v4, %v35_v3  ;;  %v226_v9 = vpack.c.bf16 %v38_v8, %v37_v7  ;;  %v39_v10 = vld [vmem:[%s342_s2 + $0x20] sm:$0xff]  ;;  %219 = vmatprep.mubr.msk.f32.mxu0 %vm254_vm0, %v255_v12  ;;  %v41_v15 = vld [vmem:[%s342_s2 + $0x30] sm:$0xff]  ;;  %v42_v16 = vld [vmem:[%s342_s2 + $0x38] sm:$0xff]  ;;  %v25_v31 = vshrl.u32 %v24_v30, 7 }
   0x4   :  { %v229_v13 = vpack.c.bf16 %v40_v11, %v39_v10  ;;  %147 = vperm.xlu1 %251, %v169_v14   ;;  %v232_v17 = vpack.c.bf16 %v42_v16, %v41_v15  ;;  %v43_v18 = vld [vmem:[%s342_s2 + $0x40] sm:$0xff]  ;;  %v44_v19 = vld [vmem:[%s342_s2 + $0x48] sm:$0xff]  ;;  %v45_v21 = vld [vmem:[%s342_s2 + $0x50] sm:$0xff] }
   0x5   :  { %224 = vmatpush3.bf16.msra.mxu0 %v223_v6  ;;  %v235_v20 = vpack.c.bf16 %v44_v19, %v43_v18  ;;  %v46_v22 = vld [vmem:[%s342_s2 + $0x58] sm:$0xff]  ;;  %v47_v24 = vld [vmem:[%s342_s2 + $0x60] sm:$0xff]  ;;  %v48_v25 = vld [vmem:[%s342_s2 + $0x68] sm:$0xff]  ;;  %v26_v32 = vsub.s32 0, %v25_v31  ;;  %v31_v34 = vsub.s32 1, %v25_v31  ;;  %v128_v41 = vsub.s32 2, %v25_v31 }
   0x6   :  { %225 = vmatprep.subr.bf16.mxu0 %v253_v2  ;;  %138 = vperm.xlu0 %250, %v131_v5   ;;  %v238_v23 = vpack.c.bf16 %v46_v22, %v45_v21  ;;  %v241_v26 = vpack.c.bf16 %v48_v25, %v47_v24  ;;  %v49_v27 = vld [vmem:[%s342_s2 + $0x70] sm:$0xff]  ;;  %v50_v28 = vld [vmem:[%s342_s2 + $0x78] sm:$0xff]  ;;  %v18_v33 = vld [vmem:[%s343_s1] sm:$0x3]  ;;  %v155_v54 = vsub.s32 3, %v25_v31  ;;  %v160_v56 = vsub.s32 4, %v25_v31 }
   0x7   :  { %v244_v29 = vpack.c.bf16 %v50_v28, %v49_v27  ;;  %v27_v35 = vrot.slane %v18_v33, %v26_v32  ;;  %v32_v36 = vrot.slane %v18_v33, %v31_v34  ;;  %v51_v42 = vld [vmem:[%s344_s3] sm:$0xff] }
   0x8   :  { %v135_v43 = vrot.slane %v51_v42, %v31_v34  ;;  %v55_v44 = vrot.slane %v51_v42, %v26_v32  ;;  %v129_v46 = vrot.slane %v51_v42, %v128_v41  ;;  %v156_v58 = vrot.slane %v51_v42, %v155_v54 }
   0x9   :  { %227 = vmatpush3.bf16.msra.mxu0 %v226_v9  ;;  %v161_v60 = vrot.slane %v51_v42, %v160_v56 }
   0xa   :  { %228 = vmatprep.subr.bf16.mxu0 %v253_v2 }
   0xd   :  { %230 = vmatpush3.bf16.msra.mxu0 %v229_v13 }
   0xe   :  { %231 = vmatprep.subr.bf16.mxu0 %v253_v2 }
  0x11   :  { %233 = vmatpush3.bf16.msra.mxu0 %v232_v17 }
  0x12   :  { %234 = vmatprep.subr.bf16.mxu0 %v253_v2 }
  0x15   :  { %236 = vmatpush3.bf16.msra.mxu0 %v235_v20 }
  0x16   :  { %237 = vmatprep.subr.bf16.mxu0 %v253_v2 }
  0x19   :  { %239 = vmatpush3.bf16.msra.mxu0 %v238_v23 }
  0x1a   :  { %240 = vmatprep.subr.bf16.mxu0 %v253_v2 }
  0x1d   :  { %242 = vmatpush3.bf16.msra.mxu0 %v241_v26 }
  0x1e   :  { %243 = vmatprep.subr.bf16.mxu0 %v253_v2 }
  0x21   :  { %245 = vmatpush3.bf16.msra.mxu0 %v244_v29 }
  0x81   :  { %v22_v37 = vpop.permute.xlu0 %21 }
  0x82   :  { %v28_v38 = vmul.f32 %v27_v35, %v22_v37  ;;  %v130_v52 = vmul.f32 %v129_v46, %v22_v37 }
  0x83   :  { %v148_v51 = vpop.permute.xlu1 %147 }
  0x84   :  { %v33_v39 = vadd.f32 %v32_v36, %v28_v38 }
  0x85   :  { %v139_v45 = vpop.permute.xlu0 %138 }
  0x86   :  { %v34_v40 = vmax.f32 %v33_v39, 0.0  ;;  %v141_v48 = vmul.f32 %v139_v45, %v135_v43 }
  0x88   :  { %220 = vmatmul.mubr.f32.vlgmr.msra.gmra.mrb[0].mxu0 %v34_v40  ;;  %v142_v55 = vadd.f32 %v141_v48, %v130_v52 }
 0x15b   :  { %v122_v47 = vpop.f32.mrb[0].mxu0 }
 0x15c   :  { %v123_v49 = vadd.f32 %v122_v47, %v55_v44  ;;  %v221_v50 = vpop.f32.mrb[1].mxu0 }
 0x15e   :  { %v143_v53 = vmul.f32 %v123_v49, %v22_v37 }
 0x160   :  { %v150_v57 = vmul.f32 %v148_v51, %v143_v53 }
 0x162   :  { %v151_v59 = vadd.f32 %v150_v57, %v142_v55 }
 0x164   :  { %v152_v61 = vand.u32 2147483647, %v151_v59 }
 0x166   :  { %v157_v62 = vmax.f32 %v156_v58, %v152_v61 }
 0x168   :  { %v162_v63 = vmin.f32 %v161_v60, %v157_v62 }
 0x16a   :  { %164 = vst.msk [vmem:[%s345_s4] sm:$0xff] %vm163_vm1, %v162_v63 }

</bundles_post_ra>
